<compile_context>
chip_gen: v5e
topology: v5e:2x2
jax: 0.10.0
libtpu: 0.0.40
codegen_flags: <defaults>
</compile_context>

<pallas_src>
import jax
import jax.numpy as jnp
from jax import lax
from jax.experimental import pallas as pl
from jax.experimental.pallas import tpu as pltpu

LANE = 128     # TPU lane width
SUBLANE = 8    # TPU sublane width


def _net_kernel(x_ref, w1_ref, b1_ref, w2_ref, b2_ref, o_ref):
    # fc1 + ReLU: (block_b, obs) @ (obs, h_pad) -> (block_b, h_pad); f32 MXU acc,
    # bias add + ReLU in f32 on the VPU.
    h = jnp.dot(x_ref[...], w1_ref[...], preferred_element_type=jnp.float32)
    h = jnp.maximum(h + b1_ref[...], 0.0)                 # (block_b, h_pad)
    # fc2 in the transposed/compact output layout:
    #   out^T = W2 @ h^T, contraction over h_pad (RHS-transposed matmul on MXU).
    # w2_ref is (a_sub, h_pad) -- the natural torch (out, in) layout, padded.
    out_t = lax.dot_general(w2_ref[...], h,
                            dimension_numbers=(((1,), (1,)), ((), ())),
                            preferred_element_type=jnp.float32)
    # (a_sub=8, block_b): lanes = batch -> lane-dense, unmasked stores.
    o_ref[...] = (out_t + b2_ref[...]).astype(o_ref.dtype)


def _round_up(x, m):
    return pl.cdiv(x, m) * m


def _default_num_tiles():
    # v7x has 2 TensorCores per chip; a balanced >=2-tile "parallel" batch grid
    # lets both cores work.  Single-TC parts (v5e/v6e): one big tile is best
    # (the grid is a serial loop there, extra steps are pure overhead).
    try:
        kind = jax.devices()[0].device_kind.lower()
        if "v7" in kind or "7x" in kind:
            return 2
    except Exception:
        pass
    return 1


def pad_params(w1, b1, w2, b2):
    """Pad params ONCE at init time into kernel-friendly, zero-padded layouts.

    w1:(obs,hidden) b1:(1,hidden) w2:(hidden,n_actions) b2:(1,n_actions)
    Returns:
      w1p:(obs,h_pad)  b1p:(1,h_pad)  w2t:(a_sub,h_pad)  b2c:(a_sub,1)
    Zero padding leaves forward() numerically identical on the real slice.
    """
    obs, hidden = w1.shape
    n_actions = w2.shape[1]
    h_pad = _round_up(hidden, LANE)         # 200 -> 256 (lane axis of h)
    a_sub = _round_up(n_actions, SUBLANE)   # 4   -> 8   (sublane axis of out^T)
    w1p = jnp.zeros((obs, h_pad), w1.dtype).at[:, :hidden].set(w1)
    b1p = jnp.zeros((1, h_pad), b1.dtype).at[:, :hidden].set(b1)
    w2t = jnp.zeros((a_sub, h_pad), w2.dtype).at[:n_actions, :hidden].set(w2.T)
    b2c = jnp.zeros((a_sub, 1), b2.dtype).at[:n_actions, 0].set(b2[0])
    return w1p, b1p, w2t, b2c


def net_forward(x, w1p, b1p, w2t, b2c, n_actions, *, block_b=None,
                max_block_b=2048):
    """x: (B, obs).  Padded params from pad_params().

    Returns (B, n_actions) logits, identical to relu(x@W1+b1)@W2+b2.
    """
    B, obs = x.shape
    h_pad = w1p.shape[1]
    a_sub = w2t.shape[0]

    if block_b is None:
        # One tile per TensorCore when the batch fits; cap the per-tile size.
        block_b = _round_up(pl.cdiv(B, _default_num_tiles()), LANE)
        block_b = min(block_b, max_block_b)
    block_b = _round_up(block_b, LANE)

    num_blocks = pl.cdiv(B, block_b)
    b_pad = num_blocks * block_b
    if b_pad != B:
        # Only the ragged tail is padded.  For fixed serving shapes pick B (or
        # block_b) so this branch is skipped (avoids an extra HBM copy of x).
        x = jnp.pad(x, ((0, b_pad - B), (0, 0)))

    # Rough per-step VMEM footprint (double-buffered streamed tiles + resident
    # weights + h intermediate).  Only raise the scoped-VMEM limit if the
    # conservative default (16 MiB on v5e) would be exceeded.
    vmem_bytes = (2 * block_b * obs * 4                       # x tiles
                  + 2 * a_sub * block_b * 4                   # out tiles
                  + 2 * (obs * h_pad + h_pad + a_sub * h_pad + a_sub) * 4
                  + block_b * h_pad * 4)                      # h intermediate
    cp = dict(dimension_semantics=("parallel",))
    if vmem_bytes > 12 * 1024 * 1024:
        cp["vmem_limit_bytes"] = min(2 * vmem_bytes, 48 * 1024 * 1024)

    out_t = pl.pallas_call(
        _net_kernel,
        out_shape=jax.ShapeDtypeStruct((a_sub, b_pad), x.dtype),
        grid=(num_blocks,),
        in_specs=[
            # x streams per batch tile (lane dim = obs = full array dim).
            pl.BlockSpec((block_b, obs), lambda i: (i, 0)),
            # Weights/biases: constant index_map -> DMA'd once, VMEM-resident.
            pl.BlockSpec((obs, h_pad), lambda i: (0, 0)),
            pl.BlockSpec((1, h_pad), lambda i: (0, 0)),
            pl.BlockSpec((a_sub, h_pad), lambda i: (0, 0)),
            pl.BlockSpec((a_sub, 1), lambda i: (0, 0)),
        ],
        # Compact transposed output: (a_sub, b_pad), batch on the lane axis.
        out_specs=pl.BlockSpec((a_sub, block_b), lambda i: (0, i)),
        compiler_params=pltpu.CompilerParams(**cp),
    )(x, w1p, b1p, w2t, b2c)

    # Strip action/batch padding and transpose back (tiny (4, B) array).
    return out_t[:n_actions, :B].T


def init_params(key, obs_size, hidden_size, n_actions, dtype=jnp.float32):
    """Deterministic init mimicking torch.nn.Linear default
    (U(-1/sqrt(fan_in), +1/sqrt(fan_in)))."""
    k1, k2, k3, k4 = jax.random.split(key, 4)
    bound1 = 1.0 / jnp.sqrt(jnp.asarray(obs_size, dtype))
    bound2 = 1.0 / jnp.sqrt(jnp.asarray(hidden_size, dtype))
    w1 = jax.random.uniform(k1, (obs_size, hidden_size), dtype, -bound1, bound1)
    b1 = jax.random.uniform(k2, (1, hidden_size), dtype, -bound1, bound1)
    w2 = jax.random.uniform(k3, (hidden_size, n_actions), dtype, -bound2, bound2)
    b2 = jax.random.uniform(k4, (1, n_actions), dtype, -bound2, bound2)
    return w1, b1, w2, b2


if __name__ == "__main__":
    # LunarLander-v2: obs_size=8, n_actions=4; hidden_size=200, batch_size=100
    # as in the original script.
    obs_size, hidden_size, n_actions = 8, 200, 4

    key = jax.random.PRNGKey(0)
    kx1, kx2, kp = jax.random.split(key, 3)
    w1, b1, w2, b2 = init_params(kp, obs_size, hidden_size, n_actions)
    w1p, b1p, w2t, b2c = pad_params(w1, b1, w2, b2)   # once, at init time

    def ref_fwd(x):
        return jnp.maximum(x @ w1 + b1, 0.0) @ w2 + b2

    # Case 1: batch_size=100, default tile selection (single big tile / 2 on v7x).
    x1 = jax.random.normal(kx1, (100, obs_size), dtype=jnp.float32)
    out1 = jax.block_until_ready(net_forward(x1, w1p, b1p, w2t, b2c, n_actions))
    assert out1.shape == (100, n_actions)
    assert jnp.allclose(out1, ref_fwd(x1), atol=1e-5, rtol=1e-5)

    # Case 2: force a multi-step grid + ragged batch padding path.
    x2 = jax.random.normal(kx2, (300, obs_size), dtype=jnp.float32)
    out2 = jax.block_until_ready(
        net_forward(x2, w1p, b1p, w2t, b2c, n_actions, block_b=128))
    assert out2.shape == (300, n_actions)
    assert jnp.allclose(out2, ref_fwd(x2), atol=1e-5, rtol=1e-5)

    print("KERNEL_OK")
</pallas_src>

<mosaic_0001>
module attributes {stable_mosaic.version = 11 : i64} {
  func.func @_net_kernel(%arg0: i32, %arg1: memref<128x8xf32, #tpu.memory_space<vmem>>, %arg2: memref<8x256xf32, #tpu.memory_space<vmem>>, %arg3: memref<1x256xf32, #tpu.memory_space<vmem>>, %arg4: memref<8x256xf32, #tpu.memory_space<vmem>>, %arg5: memref<8x1xf32, #tpu.memory_space<vmem>>, %arg6: memref<8x128xf32, #tpu.memory_space<vmem>>) attributes {dimension_semantics = [#tpu.dimension_semantics<parallel>], iteration_bounds = array<i64: 1>, scalar_prefetch = 0 : i64, scratch_operands = 0 : i64, tpu.core_type = #tpu.core_type<tc>, window_params = [{transform_indices = @transform_0, window_bounds = array<i64: 128, 8>}, {pipeline_mode = #tpu.pipeline_mode<synchronous>, transform_indices = @transform_1, window_bounds = array<i64: 8, 256>}, {pipeline_mode = #tpu.pipeline_mode<synchronous>, transform_indices = @transform_2, window_bounds = array<i64: 1, 256>}, {pipeline_mode = #tpu.pipeline_mode<synchronous>, transform_indices = @transform_3, window_bounds = array<i64: 8, 256>}, {pipeline_mode = #tpu.pipeline_mode<synchronous>, transform_indices = @transform_4, window_bounds = array<i64: 8, 1>}, {transform_indices = @transform_5, window_bounds = array<i64: 8, 128>}]} {
    %c0 = arith.constant 0 : index
    %c0_0 = arith.constant 0 : index
    %0 = vector.load %arg1[%c0, %c0_0] : memref<128x8xf32, #tpu.memory_space<vmem>>, vector<128x8xf32>
    %c0_1 = arith.constant 0 : index
    %c0_2 = arith.constant 0 : index
    %1 = vector.load %arg2[%c0_1, %c0_2] : memref<8x256xf32, #tpu.memory_space<vmem>>, vector<8x256xf32>
    %cst = arith.constant dense<0.000000e+00> : vector<128x256xf32>
    %2 = tpu.matmul %0, %1, %cst {dimension_numbers = #tpu.dot_dimension_numbers<[1], [0], [0], [1], [0, 0, 1, 1], [], []>} : vector<128x8xf32>, vector<8x256xf32>, vector<128x256xf32> -> vector<128x256xf32>
    %c0_3 = arith.constant 0 : index
    %c0_4 = arith.constant 0 : index
    %3 = vector.load %arg3[%c0_3, %c0_4] : memref<1x256xf32, #tpu.memory_space<vmem>>, vector<1x256xf32>
    %4 = vector.broadcast %3 : vector<1x256xf32> to vector<128x256xf32>
    %5 = arith.addf %2, %4 : vector<128x256xf32>
    %cst_5 = arith.constant 0.000000e+00 : f32
    %6 = vector.broadcast %cst_5 : f32 to vector<128x256xf32>
    %7 = arith.maximumf %5, %6 : vector<128x256xf32>
    %c0_6 = arith.constant 0 : index
    %c0_7 = arith.constant 0 : index
    %8 = vector.load %arg4[%c0_6, %c0_7] : memref<8x256xf32, #tpu.memory_space<vmem>>, vector<8x256xf32>
    %cst_8 = arith.constant dense<0.000000e+00> : vector<8x128xf32>
    %9 = tpu.matmul %8, %7, %cst_8 {dimension_numbers = #tpu.dot_dimension_numbers<[1], [1], [0], [0], [0, 0, 1, 0], [], []>} : vector<8x256xf32>, vector<128x256xf32>, vector<8x128xf32> -> vector<8x128xf32>
    %c0_9 = arith.constant 0 : index
    %c0_10 = arith.constant 0 : index
    %10 = vector.load %arg5[%c0_9, %c0_10] : memref<8x1xf32, #tpu.memory_space<vmem>>, vector<8x1xf32>
    %11 = vector.broadcast %10 : vector<8x1xf32> to vector<8x128xf32>
    %12 = arith.addf %9, %11 : vector<8x128xf32>
    %c0_11 = arith.constant 0 : index
    %c0_12 = arith.constant 0 : index
    %13 = vector.load %arg6[%c0_11, %c0_12] : memref<8x128xf32, #tpu.memory_space<vmem>>, vector<8x128xf32>
    tpu.vector_store %arg6[%c0_11, %c0_12], %12 {strides = array<i32>} : memref<8x128xf32, #tpu.memory_space<vmem>>, vector<8x128xf32>,
    return
  }
  func.func @transform_0(%arg0: i32) -> (i32, i32) {
    %c0_i32 = arith.constant 0 : i32
    %c0_i32_0 = arith.constant 0 : i32
    return %arg0, %c0_i32 : i32, i32
  }
  func.func @transform_1(%arg0: i32) -> (i32, i32) {
    %c0_i32 = arith.constant 0 : i32
    %c0_i32_0 = arith.constant 0 : i32
    %c0_i32_1 = arith.constant 0 : i32
    return %c0_i32, %c0_i32_0 : i32, i32
  }
  func.func @transform_2(%arg0: i32) -> (i32, i32) {
    %c0_i32 = arith.constant 0 : i32
    %c0_i32_0 = arith.constant 0 : i32
    %c0_i32_1 = arith.constant 0 : i32
    return %c0_i32, %c0_i32_0 : i32, i32
  }
  func.func @transform_3(%arg0: i32) -> (i32, i32) {
    %c0_i32 = arith.constant 0 : i32
    %c0_i32_0 = arith.constant 0 : i32
    %c0_i32_1 = arith.constant 0 : i32
    return %c0_i32, %c0_i32_0 : i32, i32
  }
  func.func @transform_4(%arg0: i32) -> (i32, i32) {
    %c0_i32 = arith.constant 0 : i32
    %c0_i32_0 = arith.constant 0 : i32
    %c0_i32_1 = arith.constant 0 : i32
    return %c0_i32, %c0_i32_0 : i32, i32
  }
  func.func @transform_5(%arg0: i32) -> (i32, i32) {
    %c0_i32 = arith.constant 0 : i32
    %c0_i32_0 = arith.constant 0 : i32
    return %c0_i32, %arg0 : i32, i32
  }
}

</mosaic_0001>

<bundles_post_ra>
// kernel: tpu_custom_call.1
= control target key start
LH: loop header
LB: loop body
LE: loop exit
PB: predicated region body
PF: predicated region fallthrough
CT: control target
= control target key end

     0   :  { %vm45_vm0 = vcmask 64512   ;;  %s599_s0 = inlined_call_operand.vmem [shape: f32[128,8], index: 0, kind: input, shape index: {}]   ;;  %s600_s1 = inlined_call_operand.vmem [shape: f32[8,256], index: 1, kind: input, shape index: {}]   ;;  %s601_s2 = inlined_call_operand.vmem [shape: f32[1,256], index: 2, kind: input, shape index: {}]   ;;  %s602_s3 = inlined_call_operand.vmem [shape: f32[8,256], index: 3, kind: input, shape index: {}]   ;;  %s603_s4 = inlined_call_operand.vmem [shape: f32[8,1], index: 4, kind: input, shape index: {}]   ;;  %s604_s5 = inlined_call_operand.hbm [shape: f32[8,128], index: 5, kind: output, shape index: {}]  }
   0x1   :  { %v37_v0 = vld [vmem:[%s600_s1] sm:$0xff]  ;;  %v38_v1 = vld [vmem:[%s600_s1 + $0x8] sm:$0xff] }
   0x2   :  { %v21_v2 = vld [vmem:[%s599_s0] sm:$0xff]  ;;  %109 = vmatpush.msra.mxu0 %v37_v0  ;;  %174 = vmatpush.msra.mxu1 %v38_v1 }
   0x3   :  { %321 = vmatmul.msk.f32.vlgmr.msra.gmra.mxu0 %vm45_vm0, %v21_v2  ;;  %337 = vmatmul.msk.f32.vlgmr.msra.gmra.mxu1 %vm45_vm0, %v21_v2 }
   0x4   :  { %10 = vsyncpa [#allocation3], 0  ;;  %v22_v3 = vld [vmem:[%s599_s0 + $0x8] sm:$0xff]  ;;  %v23_v4 = vld [vmem:[%s599_s0 + $0x10] sm:$0xff]  ;;  %s383_s7 = smov [#allocation2]   ;;  %s312_s11 = sshll.u32 %s604_s5, 4  ;;  %s313_s11 = int_to_ptr.hbm [resolvable:$true] %s312_s11 }
   0x5   :  { %v24_v5 = vld [vmem:[%s599_s0 + $0x18] sm:$0xff]  ;;  %v25_v6 = vld [vmem:[%s599_s0 + $0x20] sm:$0xff]  ;;  %v26_v7 = vld [vmem:[%s599_s0 + $0x28] sm:$0xff]  ;;  %s310_s8 = sshll.u32 %s383_s7, 4  ;;  %s311_s8 = int_to_ptr.vmem [resolvable:$true] %s310_s8 }
   0x6   :  { %v27_v8 = vld [vmem:[%s599_s0 + $0x30] sm:$0xff]  ;;  %v28_v9 = vld [vmem:[%s599_s0 + $0x38] sm:$0xff]  ;;  %v29_v10 = vld [vmem:[%s599_s0 + $0x40] sm:$0xff] }
   0x7   :  { %v30_v11 = vld [vmem:[%s599_s0 + $0x48] sm:$0xff]  ;;  %v31_v12 = vld [vmem:[%s599_s0 + $0x50] sm:$0xff]  ;;  %v32_v13 = vld [vmem:[%s599_s0 + $0x58] sm:$0xff] }
   0x8   :  { %v33_v14 = vld [vmem:[%s599_s0 + $0x60] sm:$0xff]  ;;  %v34_v15 = vld [vmem:[%s599_s0 + $0x68] sm:$0xff]  ;;  %v35_v16 = vld [vmem:[%s599_s0 + $0x70] sm:$0xff] }
   0x9   :  { %v36_v17 = vld [vmem:[%s599_s0 + $0x78] sm:$0xff]  ;;  %v39_v48 = vld [vmem:[%s601_s2] sm:$0x3] }
   0xa   :  { %v535_v49 = vperm.slane %v39_v48, 0  ;;  %v537_v50 = vperm.slane %v39_v48, 1 }
   0xb   :  { %322 = vmatmul.msk.f32.gmra.mxu0 %vm45_vm0, %v22_v3  ;;  %338 = vmatmul.msk.f32.gmra.mxu1 %vm45_vm0, %v22_v3 }
  0x13   :  { %323 = vmatmul.msk.f32.gmra.mxu0 %vm45_vm0, %v23_v4  ;;  %339 = vmatmul.msk.f32.gmra.mxu1 %vm45_vm0, %v23_v4 }
  0x1b   :  { %324 = vmatmul.msk.f32.gmra.mxu0 %vm45_vm0, %v24_v5  ;;  %340 = vmatmul.msk.f32.gmra.mxu1 %vm45_vm0, %v24_v5 }
  0x23   :  { %325 = vmatmul.msk.f32.gmra.mxu0 %vm45_vm0, %v25_v6  ;;  %341 = vmatmul.msk.f32.gmra.mxu1 %vm45_vm0, %v25_v6 }
  0x2b   :  { %326 = vmatmul.msk.f32.gmra.mxu0 %vm45_vm0, %v26_v7  ;;  %342 = vmatmul.msk.f32.gmra.mxu1 %vm45_vm0, %v26_v7 }
  0x33   :  { %327 = vmatmul.msk.f32.gmra.mxu0 %vm45_vm0, %v27_v8  ;;  %343 = vmatmul.msk.f32.gmra.mxu1 %vm45_vm0, %v27_v8 }
  0x3b   :  { %328 = vmatmul.msk.f32.gmra.mxu0 %vm45_vm0, %v28_v9  ;;  %344 = vmatmul.msk.f32.gmra.mxu1 %vm45_vm0, %v28_v9 }
  0x43   :  { %329 = vmatmul.msk.f32.gmra.mxu0 %vm45_vm0, %v29_v10  ;;  %345 = vmatmul.msk.f32.gmra.mxu1 %vm45_vm0, %v29_v10 }
  0x4b   :  { %330 = vmatmul.msk.f32.gmra.mxu0 %vm45_vm0, %v30_v11  ;;  %346 = vmatmul.msk.f32.gmra.mxu1 %vm45_vm0, %v30_v11 }
  0x53   :  { %331 = vmatmul.msk.f32.gmra.mxu0 %vm45_vm0, %v31_v12  ;;  %347 = vmatmul.msk.f32.gmra.mxu1 %vm45_vm0, %v31_v12 }
  0x5b   :  { %332 = vmatmul.msk.f32.gmra.mxu0 %vm45_vm0, %v32_v13  ;;  %348 = vmatmul.msk.f32.gmra.mxu1 %vm45_vm0, %v32_v13 }
  0x63   :  { %333 = vmatmul.msk.f32.gmra.mxu0 %vm45_vm0, %v33_v14  ;;  %349 = vmatmul.msk.f32.gmra.mxu1 %vm45_vm0, %v33_v14 }
  0x6b   :  { %334 = vmatmul.msk.f32.gmra.mxu0 %vm45_vm0, %v34_v15  ;;  %350 = vmatmul.msk.f32.gmra.mxu1 %vm45_vm0, %v34_v15 }
  0x73   :  { %335 = vmatmul.msk.f32.gmra.mxu0 %vm45_vm0, %v35_v16  ;;  %351 = vmatmul.msk.f32.gmra.mxu1 %vm45_vm0, %v35_v16 }
  0x7b   :  { %336 = vmatmul.msk.f32.gmra.mxu0 %vm45_vm0, %v36_v17  ;;  %352 = vmatmul.msk.f32.gmra.mxu1 %vm45_vm0, %v36_v17 }
  0x80   :  { %v500_v18 = vpop.f32.mrf.mxu0  ;;  %v502_v19 = vpop.f32.mrf.mxu1 }
  0x88   :  { %v504_v20 = vpop.f32.mrf.mxu0  ;;  %v506_v21 = vpop.f32.mrf.mxu1 }
  0x90   :  { %v508_v22 = vpop.f32.mrf.mxu0  ;;  %v510_v23 = vpop.f32.mrf.mxu1 }
  0x98   :  { %v512_v24 = vpop.f32.mrf.mxu0  ;;  %v514_v25 = vpop.f32.mrf.mxu1 }
  0xa0   :  { %v516_v26 = vpop.f32.mrf.mxu0  ;;  %v518_v27 = vpop.f32.mrf.mxu1 }
  0xa8   :  { %v520_v28 = vpop.f32.mrf.mxu0  ;;  %v522_v29 = vpop.f32.mrf.mxu1 }
  0xb0   :  { %v524_v30 = vpop.f32.mrf.mxu0  ;;  %v526_v31 = vpop.f32.mrf.mxu1 }
  0xb8   :  { %v528_v32 = vpop.f32.mrf.mxu0  ;;  %v530_v33 = vpop.f32.mrf.mxu1 }
  0xc0   :  { %v135_v34 = vpop.f32.mrf.mxu0  ;;  %v200_v35 = vpop.f32.mrf.mxu1 }
  0xc1   :  { %v136_v15 = vadd.f32 %v135_v34, %v535_v49  ;;  %v201_v16 = vadd.f32 %v200_v35, %v537_v50  ;;  %v195_v34 = vadd.f32 %v526_v31, %v537_v50  ;;  %v124_v31 = vadd.f32 %v516_v26, %v535_v49 }
  0xc2   :  { %v118_v26 = vadd.f32 %v508_v22, %v535_v49  ;;  %v112_v22 = vadd.f32 %v500_v18, %v535_v49 }
  0xc8   :  { %v138_v36 = vpop.f32.mrf.mxu0  ;;  %v203_v37 = vpop.f32.mrf.mxu1 }
  0xc9   :  { %v139_v11 = vadd.f32 %v138_v36, %v535_v49  ;;  %v204_v12 = vadd.f32 %v203_v37, %v537_v50  ;;  %v198_v36 = vadd.f32 %v530_v33, %v537_v50  ;;  %v241_v37 = vmax.f32 %v201_v16, 0.0 }
  0xca   :  { %v127_v33 = vadd.f32 %v520_v28, %v535_v49  ;;  %v121_v28 = vadd.f32 %v512_v24, %v535_v49  ;;  %v115_v24 = vadd.f32 %v504_v20, %v535_v49  ;;  %v256_v20 = vld [vmem:[%s602_s3] sm:$0xff] }
  0xcb   :  { %v242_v17 = vmax.f32 %v139_v11, 0.0 }
  0xd0   :  { %v141_v38 = vpop.f32.mrf.mxu0  ;;  %v206_v39 = vpop.f32.mrf.mxu1 }
  0xd1   :  { %v142_v7 = vadd.f32 %v141_v38, %v535_v49  ;;  %v207_v8 = vadd.f32 %v206_v39, %v537_v50  ;;  %v243_v38 = vmax.f32 %v204_v12, 0.0  ;;  %v133_v39 = vadd.f32 %v528_v32, %v535_v49 }
  0xd2   :  { %v382_v32 = vmov 0  }
  0xd3   :  { %v244_v13 = vmax.f32 %v142_v7, 0.0  ;;  %v245_v14 = vmax.f32 %v207_v8, 0.0  ;;  %v238_v35 = vmax.f32 %v133_v39, 0.0  ;;  %355 = vset.pattern.permute.xlu0 %v382_v32 }
  0xd8   :  { %v144_v40 = vpop.f32.mrf.mxu0  ;;  %v209_v41 = vpop.f32.mrf.mxu1 }
  0xd9   :  { %v145_v3 = vadd.f32 %v144_v40, %v535_v49  ;;  %v210_v4 = vadd.f32 %v209_v41, %v537_v50  ;;  %v240_v40 = vmax.f32 %v136_v15, 0.0  ;;  %v130_v41 = vadd.f32 %v524_v30, %v535_v49 }
  0xdb   :  { %v246_v9 = vmax.f32 %v145_v3, 0.0  ;;  %v247_v10 = vmax.f32 %v210_v4, 0.0  ;;  %v236_v30 = vmax.f32 %v130_v41, 0.0 }
  0xe0   :  { %v147_v42 = vpop.f32.mrf.mxu0  ;;  %v212_v43 = vpop.f32.mrf.mxu1 }
  0xe1   :  { %v148_v63 = vadd.f32 %v147_v42, %v535_v49  ;;  %v213_v0 = vadd.f32 %v212_v43, %v537_v50  ;;  %v239_v42 = vmax.f32 %v198_v36, 0.0  ;;  %v258_v43 = vld [vmem:[%s603_s4] sm:$0xff] }
  0xe2   :  { %261 = vperm.xlu0 %355, %v258_v43  }
  0xe3   :  { %v248_v5 = vmax.f32 %v148_v63, 0.0  ;;  %v249_v6 = vmax.f32 %v213_v0, 0.0 }
  0xe8   :  { %v150_v44 = vpop.f32.mrf.mxu0  ;;  %v215_v45 = vpop.f32.mrf.mxu1 }
  0xe9   :  { %v151_v59 = vadd.f32 %v150_v44, %v535_v49  ;;  %v216_v60 = vadd.f32 %v215_v45, %v537_v50  ;;  %v192_v44 = vadd.f32 %v522_v29, %v537_v50  ;;  %v237_v45 = vmax.f32 %v195_v34, 0.0 }
  0xea   :  { %v186_v29 = vadd.f32 %v514_v25, %v537_v50  ;;  %v180_v25 = vadd.f32 %v506_v21, %v537_v50  ;;  %v257_v21 = vld [vmem:[%s602_s3 + $0x8] sm:$0xff] }
  0xeb   :  { %v250_v1 = vmax.f32 %v151_v59, 0.0  ;;  %v251_v2 = vmax.f32 %v216_v60, 0.0  ;;  %v235_v48 = vmax.f32 %v192_v44, 0.0  ;;  %v224_v59 = vmax.f32 %v112_v22, 0.0 }
  0xf0   :  { %v153_v46 = vpop.f32.mrf.mxu0  ;;  %v218_v47 = vpop.f32.mrf.mxu1 }
  0xf1   :  { %v154_v55 = vadd.f32 %v153_v46, %v535_v49  ;;  %v219_v56 = vadd.f32 %v218_v47, %v537_v50  ;;  %v189_v46 = vadd.f32 %v518_v27, %v537_v50  ;;  %v234_v47 = vmax.f32 %v127_v33, 0.0 }
  0xf2   :  { %v183_v27 = vadd.f32 %v510_v23, %v537_v50  ;;  %v177_v23 = vadd.f32 %v502_v19, %v537_v50 }
  0xf3   :  { %v252_v61 = vmax.f32 %v154_v55, 0.0  ;;  %v253_v62 = vmax.f32 %v219_v56, 0.0  ;;  %v228_v55 = vmax.f32 %v118_v26, 0.0 }
  0xf4   :  { %v229_v56 = vmax.f32 %v183_v27, 0.0  ;;  %v225_v60 = vmax.f32 %v177_v23, 0.0 }
  0xf8   :  { %v156_v51 = vpop.f32.mrf.mxu0  ;;  %v221_v52 = vpop.f32.mrf.mxu1 }
  0xf9   :  { %v157_v53 = vadd.f32 %v156_v51, %v535_v49  ;;  %v222_v54 = vadd.f32 %v221_v52, %v537_v50  ;;  %v232_v51 = vmax.f32 %v124_v31, 0.0  ;;  %v233_v52 = vmax.f32 %v189_v46, 0.0 }
  0xfb   :  { %v254_v57 = vmax.f32 %v157_v53, 0.0  ;;  %v255_v58 = vmax.f32 %v222_v54, 0.0  ;;  %v230_v53 = vmax.f32 %v121_v28, 0.0  ;;  %v231_v54 = vmax.f32 %v186_v29, 0.0 }
  0xfd   :  { %264 = vmatpush.xpose.msra.mxu2 %v254_v57  ;;  %284 = vmatpush.xpose.msra.mxu3 %v255_v58  ;;  %v226_v57 = vmax.f32 %v115_v24, 0.0  ;;  %v227_v58 = vmax.f32 %v180_v25, 0.0 }
 0x101   :  { %265 = vmatpush.xpose.msra.mxu2 %v252_v61  ;;  %285 = vmatpush.xpose.msra.mxu3 %v253_v62 }
 0x105   :  { %266 = vmatpush.xpose.msra.mxu2 %v250_v1  ;;  %286 = vmatpush.xpose.msra.mxu3 %v251_v2 }
 0x109   :  { %267 = vmatpush.xpose.msra.mxu2 %v248_v5  ;;  %287 = vmatpush.xpose.msra.mxu3 %v249_v6 }
 0x10d   :  { %268 = vmatpush.xpose.msra.mxu2 %v246_v9  ;;  %288 = vmatpush.xpose.msra.mxu3 %v247_v10 }
 0x111   :  { %269 = vmatpush.xpose.msra.mxu2 %v244_v13  ;;  %289 = vmatpush.xpose.msra.mxu3 %v245_v14 }
 0x115   :  { %270 = vmatpush.xpose.msra.mxu2 %v242_v17  ;;  %290 = vmatpush.xpose.msra.mxu3 %v243_v38 }
 0x119   :  { %271 = vmatpush.xpose.msra.mxu2 %v240_v40  ;;  %291 = vmatpush.xpose.msra.mxu3 %v241_v37 }
 0x11d   :  { %272 = vmatpush.xpose.msra.mxu2 %v238_v35  ;;  %292 = vmatpush.xpose.msra.mxu3 %v239_v42 }
 0x121   :  { %273 = vmatpush.xpose.msra.mxu2 %v236_v30  ;;  %293 = vmatpush.xpose.msra.mxu3 %v237_v45 }
 0x125   :  { %274 = vmatpush.xpose.msra.mxu2 %v234_v47  ;;  %294 = vmatpush.xpose.msra.mxu3 %v235_v48 }
 0x129   :  { %275 = vmatpush.xpose.msra.mxu2 %v232_v51  ;;  %295 = vmatpush.xpose.msra.mxu3 %v233_v52 }
 0x12d   :  { %276 = vmatpush.xpose.msra.mxu2 %v230_v53  ;;  %296 = vmatpush.xpose.msra.mxu3 %v231_v54 }
 0x131   :  { %277 = vmatpush.xpose.msra.mxu2 %v228_v55  ;;  %297 = vmatpush.xpose.msra.mxu3 %v229_v56 }
 0x135   :  { %278 = vmatpush.xpose.msra.mxu2 %v226_v57  ;;  %298 = vmatpush.xpose.msra.mxu3 %v227_v58 }
 0x139   :  { %279 = vmatpush.xpose.msra.mxu2 %v224_v59  ;;  %299 = vmatpush.xpose.msra.mxu3 %v225_v60 }
 0x13c   :  { %280 = vmatmul.f32.vlgmr.msra.gmra.mxu2 %v256_v20  ;;  %300 = vmatmul.f32.vlgmr.msra.gmra.mxu3 %v257_v21 }
 0x154   :  { %v262_v18 = vpop.permute.xlu0 %261 }
 0x1bf   :  { %v281_v19 = vpop.f32.mrf.mxu2  ;;  %v301_v49 = vpop.f32.mrf.mxu3 }
 0x1c0   :  { %v282_v50 = vadd.f32 %v281_v19, %v262_v18 }
 0x1c2   :  { %v302_v61 = vadd.f32 %v301_v49, %v282_v50 }
 0x1c4   :  { %304 = vst [vmem:[#allocation2] sm:$0xff] %v302_v61 }
 0x1c5   :  { %315 = dma.vmem_to_hbm [thread:$0]  %s311_s8, 128, %s313_s11, [#allocation3]  }
 0x1c6   :  { %380 = dma.done.wait [#allocation3], 128  }
 0x1c7   :  { %381 = vsyncadd [#allocation3], 4294967168 }
 0x1c8   :  { %320 = vsyncpa [#allocation3], 1 }

</bundles_post_ra>
